<compile_context>
chip_gen: v7x
topology: tpu7x:2x2x1
jax: 0.10.0
libtpu: 0.0.40
codegen_flags: <defaults>
</compile_context>

<pallas_src>
import numpy as np
import jax
import jax.numpy as jnp
from jax import lax
from jax.experimental import pallas as pl
from jax.experimental.pallas import tpu as pltpu


# ---------------------------------------------------------------------------
# Batch grouping: largest divisor of N within a VMEM budget, keeping >=2
# grid steps when possible (v7x has 2 TensorCores).
# ---------------------------------------------------------------------------
def _choose_nblk(N, per_image_bytes, budget=4 << 20):
    best = 1
    for nb in range(1, N + 1):
        if N % nb:
            continue
        if nb * per_image_bytes > budget:
            continue
        if N > 1 and N // nb < 2:
            continue
        best = nb
    return best


# ---------------------------------------------------------------------------
# Static tap table + boundary masks (the conv's zero padding), batch-tiled.
# ---------------------------------------------------------------------------
def _build_taps_and_masks(stride, H, W, Ho, Wo, S_o, N_blk, W_op):
    io = np.arange(S_o) // Wo
    jo = np.arange(S_o) % Wo
    tap_table = []
    mask_rows, mask_cache = [], {}

    def midx(valid):
        if valid.all():
            return -1
        key = valid.tobytes()
        if key not in mask_cache:
            mask_cache[key] = len(mask_rows)
            row = np.zeros(W_op, np.float32)
            row[:N_blk * S_o] = np.tile(valid.astype(np.float32), N_blk)
            mask_rows.append(row)
        return mask_cache[key]

    for di in range(3):
        for dj in range(3):
            tap = di * 3 + dj
            if stride == 1:
                plane = 0
                off = (di - 1) * W + (dj - 1)
                si, sj = io + di - 1, jo + dj - 1
                valid = (si >= 0) & (si < H) & (sj >= 0) & (sj < W)
                src = si * W + sj
            else:
                rp, sr = (0, 0) if di == 1 else ((1, 0) if di == 2 else (1, -1))
                cp, sc = (0, 0) if dj == 1 else ((1, 0) if dj == 2 else (1, -1))
                plane = rp * 2 + cp
                off = sr * Wo + sc
                si, sj = io + sr, jo + sc
                valid = (si >= 0) & (sj >= 0)
                src = si * Wo + sj
            # Roll/mask invariant: every unmasked lane's source stays inside its
            # own image segment (so rolls never leak across images/planes/pad).
            assert (src[valid] >= 0).all() and (src[valid] < S_o).all()
            tap_table.append((plane, int((-off) % W_op), midx(valid), tap))
    return tap_table, mask_rows


# ---------------------------------------------------------------------------
# Pallas kernel
# ---------------------------------------------------------------------------
def _make_kernel(P, n_planes, W_op, tap_table, has_masks, has_id_sc,
                 has_conv_sc, merged_sc):
    def kernel(*refs):
        it = iter(refs)
        x_ref = next(it)
        w1_ref, b1_ref = next(it), next(it)
        wdw_ref, b2_ref = next(it), next(it)
        w3_ref, b3_ref = next(it), next(it)
        wsc_ref = bsc_ref = None
        if has_conv_sc and not merged_sc:
            wsc_ref, bsc_ref = next(it), next(it)
        elif has_conv_sc:
            bsc_ref = next(it)
        masks_ref = next(it) if has_masks else None
        o_ref = next(it)

        x = x_ref[...]                                       # (Cin, Win) bf16

        # ---- expand 1x1 (+ optionally fused conv-shortcut rows): one MXU pass
        h_all = jnp.dot(w1_ref[...], x, preferred_element_type=jnp.float32)
        if merged_sc:
            h = jnp.maximum(h_all[:P, :] + b1_ref[...], 0.0)     # (P, Win)
            sc = h_all[P:, :] + bsc_ref[...]                     # (Co, W_op)
        else:
            h = jnp.maximum(h_all + b1_ref[...], 0.0)

        # ---- 3x3 depthwise at output centers: per-plane lane rolls + masks --
        planes = ([h] if n_planes == 1 else
                  [h[:, p * W_op:(p + 1) * W_op] for p in range(n_planes)])
        wdw = wdw_ref[...]                                   # (9, P, 1) f32
        masks = masks_ref[...] if has_masks else None        # (n_masks, W_op)

        acc = None
        for plane, shift, mask_idx, tap in tap_table:
            t = planes[plane]
            if shift:
                t = pltpu.roll(t, shift, axis=1)             # XLU lane rotation
            t = t * wdw[tap]                                 # per-channel tap weight
            if mask_idx >= 0:
                t = t * masks[mask_idx:mask_idx + 1, :]      # conv zero padding
            acc = t if acc is None else acc + t
        dw = jnp.maximum(acc + b2_ref[...], 0.0)             # (P, W_op)

        # ---- project 1x1 (MXU) + bias ---------------------------------------
        out = jnp.dot(w3_ref[...], dw.astype(jnp.bfloat16),
                      preferred_element_type=jnp.float32) + b3_ref[...]

        # ---- residual shortcut (stride == 1 only) ---------------------------
        if has_id_sc:
            out = out + x.astype(jnp.float32)
        elif has_conv_sc and not merged_sc:
            out = out + (jnp.dot(wsc_ref[...], x,
                                 preferred_element_type=jnp.float32) + bsc_ref[...])
        elif has_conv_sc:
            out = out + sc

        o_ref[...] = out.astype(o_ref.dtype)

    return kernel


def _full_spec(a):
    nd = a.ndim
    return pl.BlockSpec(a.shape, lambda g, _nd=nd: (0,) * _nd)


# ---------------------------------------------------------------------------
# Wrapper
# ---------------------------------------------------------------------------
def block_forward(x, params, *, in_planes, out_planes, expansion, stride):
    """x: (N, Cin, H, W) float32 (NCHW, as in PyTorch). Returns (N, Co, Ho, Wo)."""
    N, Cin, H, W = x.shape
    assert Cin == in_planes
    assert stride in (1, 2)
    if stride == 2:
        assert H % 2 == 0 and W % 2 == 0, "stride-2 path assumes even H, W"
    P = expansion * in_planes
    Co = out_planes
    Ho, Wo = (H - 1) // stride + 1, (W - 1) // stride + 1
    S_o = Ho * Wo
    n_planes = 1 if stride == 1 else 4

    has_id_sc = (stride == 1) and (Cin == Co)
    has_conv_sc = (stride == 1) and (Cin != Co)
    merged_sc = has_conv_sc and (P % 8 == 0)

    # --- batch grouping -------------------------------------------------------
    per_img = (2 * Cin * H * W * 2      # x bf16 (double-buffered)
               + P * H * W * 4          # expanded activations (f32)
               + 3 * P * S_o * 4        # tap temp + accumulator
               + 2 * Co * S_o * 4)      # projected output (+ shortcut)
    N_blk = _choose_nblk(N, per_img)
    G = N // N_blk

    W_op = max(128, ((N_blk * S_o + 127) // 128) * 128)   # lane-dense output width
    Win = n_planes * W_op

    # --- channel-major, batch folded onto the lane axis, bf16 -----------------
    xb = x.astype(jnp.bfloat16)
    if stride == 1:
        xb = xb.reshape(N, Cin, S_o)
        xb = jnp.transpose(xb, (1, 0, 2)).reshape(Cin, G, N_blk * S_o)
        if W_op > N_blk * S_o:
            xb = jnp.pad(xb, ((0, 0), (0, 0), (0, W_op - N_blk * S_o)))
        x_cat = xb.reshape(Cin, G * Win)
    else:
        # 4 (row,col)-parity planes via pure reshape/transpose.
        xb = xb.reshape(N, Cin, Ho, 2, Wo, 2)
        xb = jnp.transpose(xb, (1, 0, 3, 5, 2, 4))          # (Cin, N, rp, cp, Ho, Wo)
        xb = xb.reshape(Cin, G, N_blk, 4, S_o)
        xb = jnp.transpose(xb, (0, 1, 3, 2, 4))             # (Cin, G, plane, N_blk, S_o)
        xb = xb.reshape(Cin, G, 4, N_blk * S_o)
        if W_op > N_blk * S_o:
            xb = jnp.pad(xb, ((0, 0), (0, 0), (0, 0), (0, W_op - N_blk * S_o)))
        x_cat = xb.reshape(Cin, G * Win)

    tap_table, mask_rows = _build_taps_and_masks(stride, H, W, Ho, Wo, S_o,
                                                 N_blk, W_op)
    has_masks = len(mask_rows) > 0

    # --- BN scales folded into weights (f32) before the bf16 cast -------------
    col = lambda v: jnp.asarray(v, jnp.float32).reshape(-1, 1)
    w1f = params["s1"][:, None] * params["w1"]
    w3f = (params["s3"][:, None] * params["w3"]).astype(jnp.bfloat16)
    wdw9 = jnp.transpose(params["s2"][:, None] * params["wdw"].reshape(P, 9),
                         (1, 0))[:, :, None].astype(jnp.float32)

    inputs = [x_cat]
    if merged_sc:
        wscf = params["ssc"][:, None] * params["wsc"]
        inputs.append(jnp.concatenate([w1f, wscf], axis=0).astype(jnp.bfloat16))
    else:
        inputs.append(w1f.astype(jnp.bfloat16))
    inputs += [col(params["b1"]), wdw9, col(params["b2"]), w3f, col(params["b3"])]
    if has_conv_sc and not merged_sc:
        inputs += [(params["ssc"][:, None] * params["wsc"]).astype(jnp.bfloat16),
                   col(params["bsc"])]
    elif merged_sc:
        inputs.append(col(params["bsc"]))
    if has_masks:
        inputs.append(jnp.asarray(np.stack(mask_rows, axis=0)))

    in_specs = [pl.BlockSpec((Cin, Win), lambda g: (0, g))]
    in_specs += [_full_spec(a) for a in inputs[1:]]
    out_spec = pl.BlockSpec((Co, W_op), lambda g: (0, g))

    kernel = _make_kernel(P, n_planes, W_op, tap_table, has_masks,
                          has_id_sc, has_conv_sc, merged_sc)

    out = pl.pallas_call(
        kernel,
        out_shape=jax.ShapeDtypeStruct((Co, G * W_op), jnp.float32),
        grid_spec=pltpu.PrefetchScalarGridSpec(
            num_scalar_prefetch=0,
            grid=(G,),
            in_specs=in_specs,
            out_specs=out_spec,
        ),
        compiler_params=pltpu.CompilerParams(dimension_semantics=("parallel",)),
    )(*inputs)

    out = out.reshape(Co, G, W_op)[:, :, :N_blk * S_o].reshape(Co, G, N_blk, S_o)
    out = jnp.transpose(out, (1, 2, 0, 3)).reshape(N, Co, Ho, Wo)
    return out


# ---------------------------------------------------------------------------
# Deterministic parameter init (shapes follow the PyTorch module's __init__)
# ---------------------------------------------------------------------------
def init_block_params(key, in_planes, out_planes, expansion, stride):
    P = expansion * in_planes
    ks = jax.random.split(key, 8)

    def bn_fold(k, c):
        k1, k2, k3, k4 = jax.random.split(k, 4)
        gamma = jax.random.uniform(k1, (c,), minval=0.5, maxval=1.5)
        beta = 0.1 * jax.random.normal(k2, (c,))
        mean = 0.1 * jax.random.normal(k3, (c,))
        var = jax.random.uniform(k4, (c,), minval=0.5, maxval=1.5)
        scale = gamma / jnp.sqrt(var + 1e-5)
        bias = beta - mean * scale
        return scale.astype(jnp.float32), bias.astype(jnp.float32)

    p = {}
    # conv1: torch (P, Cin, 1, 1) -> (P, Cin)
    p["w1"] = (0.2 * jax.random.normal(ks[0], (P, in_planes))).astype(jnp.float32)
    p["s1"], p["b1"] = bn_fold(ks[1], P)
    # conv2 (depthwise): torch (P, 1, 3, 3) -> (P, 3, 3)
    p["wdw"] = (0.2 * jax.random.normal(ks[2], (P, 3, 3))).astype(jnp.float32)
    p["s2"], p["b2"] = bn_fold(ks[3], P)
    # conv3: torch (Co, P, 1, 1) -> (Co, P)
    p["w3"] = (0.2 * jax.random.normal(ks[4], (out_planes, P))).astype(jnp.float32)
    p["s3"], p["b3"] = bn_fold(ks[5], out_planes)
    if stride == 1 and in_planes != out_planes:
        p["wsc"] = (0.2 * jax.random.normal(ks[6], (out_planes, in_planes))).astype(jnp.float32)
        p["ssc"], p["bsc"] = bn_fold(ks[7], out_planes)
    return p


# ---------------------------------------------------------------------------
# Pure-JAX reference (NCHW, f32 HIGHEST) for validation
# ---------------------------------------------------------------------------
def ref_block_forward(x, p, *, in_planes, out_planes, expansion, stride):
    P = expansion * in_planes
    hp = lax.Precision.HIGHEST

    def conv1x1(a, w):                        # w: (Cout, Cin)
        return jnp.einsum("nchw,oc->nohw", a, w, precision=hp)

    def bn(a, s, b):
        return a * s[None, :, None, None] + b[None, :, None, None]

    h = jnp.maximum(bn(conv1x1(x, p["w1"]), p["s1"], p["b1"]), 0.0)
    dw = lax.conv_general_dilated(
        h, p["wdw"][:, None, :, :], window_strides=(stride, stride),
        padding=((1, 1), (1, 1)),
        dimension_numbers=("NCHW", "OIHW", "NCHW"),
        feature_group_count=P, precision=hp)
    dw = jnp.maximum(bn(dw, p["s2"], p["b2"]), 0.0)
    out = bn(conv1x1(dw, p["w3"]), p["s3"], p["b3"])
    if stride == 1:
        if in_planes == out_planes:
            out = out + x
        else:
            out = out + bn(conv1x1(x, p["wsc"]), p["ssc"], p["bsc"])
    return out


if __name__ == "__main__":
    key = jax.random.PRNGKey(0)
    configs = [
        dict(in_planes=8, out_planes=16, expansion=3, stride=1),  # conv+BN shortcut (merged)
        dict(in_planes=8, out_planes=8, expansion=2, stride=1),   # identity shortcut
        dict(in_planes=8, out_planes=16, expansion=2, stride=2),  # no shortcut, downsample
    ]
    N, H, W = 2, 16, 16
    ok = True
    for i, cfg in enumerate(configs):
        kx, kp = jax.random.split(jax.random.fold_in(key, i))
        x = jax.random.normal(kx, (N, cfg["in_planes"], H, W), jnp.float32)
        params = init_block_params(kp, **cfg)
        y = jax.block_until_ready(block_forward(x, params, **cfg))
        y_ref = ref_block_forward(x, params, **cfg)
        # bf16 MXU operands / bf16 residual (f32 accumulation) -> looser tolerance.
        good = (y.shape == y_ref.shape) and bool(
            jnp.allclose(y, y_ref, rtol=3e-2, atol=3e-2))
        if not good:
            ok = False
            print("MISMATCH", cfg, float(jnp.max(jnp.abs(y - y_ref))))
    if ok:
        print("KERNEL_OK")
</pallas_src>

<mosaic_0001>
module attributes {stable_mosaic.version = 11 : i64} {
  func.func @kernel(%arg0: i32, %arg1: memref<8x256xbf16, #tpu.memory_space<vmem>>, %arg2: memref<40x8xbf16, #tpu.memory_space<vmem>>, %arg3: memref<24x1xf32, #tpu.memory_space<vmem>>, %arg4: memref<9x24x1xf32, #tpu.memory_space<vmem>>, %arg5: memref<24x1xf32, #tpu.memory_space<vmem>>, %arg6: memref<16x24xbf16, #tpu.memory_space<vmem>>, %arg7: memref<16x1xf32, #tpu.memory_space<vmem>>, %arg8: memref<16x1xf32, #tpu.memory_space<vmem>>, %arg9: memref<8x256xf32, #tpu.memory_space<vmem>>, %arg10: memref<16x256xf32, #tpu.memory_space<vmem>>) attributes {dimension_semantics = [#tpu.dimension_semantics<parallel>], iteration_bounds = array<i64: 2>, scalar_prefetch = 0 : i64, scratch_operands = 0 : i64, tpu.core_type = #tpu.core_type<tc>, window_params = [{transform_indices = @transform_0, window_bounds = array<i64: 8, 256>}, {pipeline_mode = #tpu.pipeline_mode<synchronous>, transform_indices = @transform_1, window_bounds = array<i64: 40, 8>}, {pipeline_mode = #tpu.pipeline_mode<synchronous>, transform_indices = @transform_2, window_bounds = array<i64: 24, 1>}, {pipeline_mode = #tpu.pipeline_mode<synchronous>, transform_indices = @transform_3, window_bounds = array<i64: 9, 24, 1>}, {pipeline_mode = #tpu.pipeline_mode<synchronous>, transform_indices = @transform_4, window_bounds = array<i64: 24, 1>}, {pipeline_mode = #tpu.pipeline_mode<synchronous>, transform_indices = @transform_5, window_bounds = array<i64: 16, 24>}, {pipeline_mode = #tpu.pipeline_mode<synchronous>, transform_indices = @transform_6, window_bounds = array<i64: 16, 1>}, {pipeline_mode = #tpu.pipeline_mode<synchronous>, transform_indices = @transform_7, window_bounds = array<i64: 16, 1>}, {pipeline_mode = #tpu.pipeline_mode<synchronous>, transform_indices = @transform_8, window_bounds = array<i64: 8, 256>}, {transform_indices = @transform_9, window_bounds = array<i64: 16, 256>}]} {
    %c0 = arith.constant 0 : index
    %c0_0 = arith.constant 0 : index
    %0 = vector.load %arg1[%c0, %c0_0] : memref<8x256xbf16, #tpu.memory_space<vmem>>, vector<8x256xbf16>
    %c0_1 = arith.constant 0 : index
    %c0_2 = arith.constant 0 : index
    %1 = vector.load %arg2[%c0_1, %c0_2] : memref<40x8xbf16, #tpu.memory_space<vmem>>, vector<40x8xbf16>
    %cst = arith.constant dense<0.000000e+00> : vector<40x256xf32>
    %2 = tpu.matmul %1, %0, %cst {dimension_numbers = #tpu.dot_dimension_numbers<[1], [0], [0], [1], [0, 0, 1, 1], [], []>} : vector<40x8xbf16>, vector<8x256xbf16>, vector<40x256xf32> -> vector<40x256xf32>
    %3 = vector.extract_strided_slice %2 {offsets = [0, 0], sizes = [24, 256], strides = [1, 1]} : vector<40x256xf32> to vector<24x256xf32>
    %c0_3 = arith.constant 0 : index
    %c0_4 = arith.constant 0 : index
    %4 = vector.load %arg3[%c0_3, %c0_4] : memref<24x1xf32, #tpu.memory_space<vmem>>, vector<24x1xf32>
    %5 = vector.broadcast %4 : vector<24x1xf32> to vector<24x256xf32>
    %6 = arith.addf %3, %5 : vector<24x256xf32>
    %cst_5 = arith.constant 0.000000e+00 : f32
    %7 = vector.broadcast %cst_5 : f32 to vector<24x256xf32>
    %8 = arith.maximumf %6, %7 : vector<24x256xf32>
    %9 = vector.extract_strided_slice %2 {offsets = [24, 0], sizes = [16, 256], strides = [1, 1]} : vector<40x256xf32> to vector<16x256xf32>
    %c0_6 = arith.constant 0 : index
    %c0_7 = arith.constant 0 : index
    %10 = vector.load %arg8[%c0_6, %c0_7] : memref<16x1xf32, #tpu.memory_space<vmem>>, vector<16x1xf32>
    %11 = vector.broadcast %10 : vector<16x1xf32> to vector<16x256xf32>
    %12 = arith.addf %9, %11 : vector<16x256xf32>
    %c0_8 = arith.constant 0 : index
    %c0_9 = arith.constant 0 : index
    %c0_10 = arith.constant 0 : index
    %13 = vector.load %arg4[%c0_8, %c0_9, %c0_10] : memref<9x24x1xf32, #tpu.memory_space<vmem>>, vector<9x24x1xf32>
    %c0_11 = arith.constant 0 : index
    %c0_12 = arith.constant 0 : index
    %14 = vector.load %arg9[%c0_11, %c0_12] : memref<8x256xf32, #tpu.memory_space<vmem>>, vector<8x256xf32>
    %c17_i32 = arith.constant 17 : i32
    %15 = tpu.dynamic_rotate %8 by %c17_i32 dim 1 : vector<24x256xf32>, i32 -> vector<24x256xf32>
    %16 = vector.extract_strided_slice %13 {offsets = [0, 0, 0], sizes = [1, 24, 1], strides = [1, 1, 1]} : vector<9x24x1xf32> to vector<1x24x1xf32>
    %17 = vector.shape_cast %16 : vector<1x24x1xf32> to vector<24x1xf32>
    %18 = vector.broadcast %17 : vector<24x1xf32> to vector<24x256xf32>
    %19 = arith.mulf %15, %18 : vector<24x256xf32>
    %20 = vector.extract_strided_slice %14 {offsets = [0, 0], sizes = [1, 256], strides = [1, 1]} : vector<8x256xf32> to vector<1x256xf32>
    %21 = vector.broadcast %20 : vector<1x256xf32> to vector<24x256xf32>
    %22 = arith.mulf %19, %21 : vector<24x256xf32>
    %c16_i32 = arith.constant 16 : i32
    %23 = tpu.dynamic_rotate %8 by %c16_i32 dim 1 : vector<24x256xf32>, i32 -> vector<24x256xf32>
    %24 = vector.extract_strided_slice %13 {offsets = [1, 0, 0], sizes = [1, 24, 1], strides = [1, 1, 1]} : vector<9x24x1xf32> to vector<1x24x1xf32>
    %25 = vector.shape_cast %24 : vector<1x24x1xf32> to vector<24x1xf32>
    %26 = vector.broadcast %25 : vector<24x1xf32> to vector<24x256xf32>
    %27 = arith.mulf %23, %26 : vector<24x256xf32>
    %28 = vector.extract_strided_slice %14 {offsets = [1, 0], sizes = [1, 256], strides = [1, 1]} : vector<8x256xf32> to vector<1x256xf32>
    %29 = vector.broadcast %28 : vector<1x256xf32> to vector<24x256xf32>
    %30 = arith.mulf %27, %29 : vector<24x256xf32>
    %31 = arith.addf %22, %30 : vector<24x256xf32>
    %c15_i32 = arith.constant 15 : i32
    %32 = tpu.dynamic_rotate %8 by %c15_i32 dim 1 : vector<24x256xf32>, i32 -> vector<24x256xf32>
    %33 = vector.extract_strided_slice %13 {offsets = [2, 0, 0], sizes = [1, 24, 1], strides = [1, 1, 1]} : vector<9x24x1xf32> to vector<1x24x1xf32>
    %34 = vector.shape_cast %33 : vector<1x24x1xf32> to vector<24x1xf32>
    %35 = vector.broadcast %34 : vector<24x1xf32> to vector<24x256xf32>
    %36 = arith.mulf %32, %35 : vector<24x256xf32>
    %37 = vector.extract_strided_slice %14 {offsets = [2, 0], sizes = [1, 256], strides = [1, 1]} : vector<8x256xf32> to vector<1x256xf32>
    %38 = vector.broadcast %37 : vector<1x256xf32> to vector<24x256xf32>
    %39 = arith.mulf %36, %38 : vector<24x256xf32>
    %40 = arith.addf %31, %39 : vector<24x256xf32>
    %c1_i32 = arith.constant 1 : i32
    %41 = tpu.dynamic_rotate %8 by %c1_i32 dim 1 : vector<24x256xf32>, i32 -> vector<24x256xf32>
    %42 = vector.extract_strided_slice %13 {offsets = [3, 0, 0], sizes = [1, 24, 1], strides = [1, 1, 1]} : vector<9x24x1xf32> to vector<1x24x1xf32>
    %43 = vector.shape_cast %42 : vector<1x24x1xf32> to vector<24x1xf32>
    %44 = vector.broadcast %43 : vector<24x1xf32> to vector<24x256xf32>
    %45 = arith.mulf %41, %44 : vector<24x256xf32>
    %46 = vector.extract_strided_slice %14 {offsets = [3, 0], sizes = [1, 256], strides = [1, 1]} : vector<8x256xf32> to vector<1x256xf32>
    %47 = vector.broadcast %46 : vector<1x256xf32> to vector<24x256xf32>
    %48 = arith.mulf %45, %47 : vector<24x256xf32>
    %49 = arith.addf %40, %48 : vector<24x256xf32>
    %50 = vector.extract_strided_slice %13 {offsets = [4, 0, 0], sizes = [1, 24, 1], strides = [1, 1, 1]} : vector<9x24x1xf32> to vector<1x24x1xf32>
    %51 = vector.shape_cast %50 : vector<1x24x1xf32> to vector<24x1xf32>
    %52 = vector.broadcast %51 : vector<24x1xf32> to vector<24x256xf32>
    %53 = arith.mulf %8, %52 : vector<24x256xf32>
    %54 = arith.addf %49, %53 : vector<24x256xf32>
    %c255_i32 = arith.constant 255 : i32
    %55 = tpu.dynamic_rotate %8 by %c255_i32 dim 1 : vector<24x256xf32>, i32 -> vector<24x256xf32>
    %56 = vector.extract_strided_slice %13 {offsets = [5, 0, 0], sizes = [1, 24, 1], strides = [1, 1, 1]} : vector<9x24x1xf32> to vector<1x24x1xf32>
    %57 = vector.shape_cast %56 : vector<1x24x1xf32> to vector<24x1xf32>
    %58 = vector.broadcast %57 : vector<24x1xf32> to vector<24x256xf32>
    %59 = arith.mulf %55, %58 : vector<24x256xf32>
    %60 = vector.extract_strided_slice %14 {offsets = [4, 0], sizes = [1, 256], strides = [1, 1]} : vector<8x256xf32> to vector<1x256xf32>
    %61 = vector.broadcast %60 : vector<1x256xf32> to vector<24x256xf32>
    %62 = arith.mulf %59, %61 : vector<24x256xf32>
    %63 = arith.addf %54, %62 : vector<24x256xf32>
    %c241_i32 = arith.constant 241 : i32
    %64 = tpu.dynamic_rotate %8 by %c241_i32 dim 1 : vector<24x256xf32>, i32 -> vector<24x256xf32>
    %65 = vector.extract_strided_slice %13 {offsets = [6, 0, 0], sizes = [1, 24, 1], strides = [1, 1, 1]} : vector<9x24x1xf32> to vector<1x24x1xf32>
    %66 = vector.shape_cast %65 : vector<1x24x1xf32> to vector<24x1xf32>
    %67 = vector.broadcast %66 : vector<24x1xf32> to vector<24x256xf32>
    %68 = arith.mulf %64, %67 : vector<24x256xf32>
    %69 = vector.extract_strided_slice %14 {offsets = [5, 0], sizes = [1, 256], strides = [1, 1]} : vector<8x256xf32> to vector<1x256xf32>
    %70 = vector.broadcast %69 : vector<1x256xf32> to vector<24x256xf32>
    %71 = arith.mulf %68, %70 : vector<24x256xf32>
    %72 = arith.addf %63, %71 : vector<24x256xf32>
    %c240_i32 = arith.constant 240 : i32
    %73 = tpu.dynamic_rotate %8 by %c240_i32 dim 1 : vector<24x256xf32>, i32 -> vector<24x256xf32>
    %74 = vector.extract_strided_slice %13 {offsets = [7, 0, 0], sizes = [1, 24, 1], strides = [1, 1, 1]} : vector<9x24x1xf32> to vector<1x24x1xf32>
    %75 = vector.shape_cast %74 : vector<1x24x1xf32> to vector<24x1xf32>
    %76 = vector.broadcast %75 : vector<24x1xf32> to vector<24x256xf32>
    %77 = arith.mulf %73, %76 : vector<24x256xf32>
    %78 = vector.extract_strided_slice %14 {offsets = [6, 0], sizes = [1, 256], strides = [1, 1]} : vector<8x256xf32> to vector<1x256xf32>
    %79 = vector.broadcast %78 : vector<1x256xf32> to vector<24x256xf32>
    %80 = arith.mulf %77, %79 : vector<24x256xf32>
    %81 = arith.addf %72, %80 : vector<24x256xf32>
    %c239_i32 = arith.constant 239 : i32
    %82 = tpu.dynamic_rotate %8 by %c239_i32 dim 1 : vector<24x256xf32>, i32 -> vector<24x256xf32>
    %83 = vector.extract_strided_slice %13 {offsets = [8, 0, 0], sizes = [1, 24, 1], strides = [1, 1, 1]} : vector<9x24x1xf32> to vector<1x24x1xf32>
    %84 = vector.shape_cast %83 : vector<1x24x1xf32> to vector<24x1xf32>
    %85 = vector.broadcast %84 : vector<24x1xf32> to vector<24x256xf32>
    %86 = arith.mulf %82, %85 : vector<24x256xf32>
    %87 = vector.extract_strided_slice %14 {offsets = [7, 0], sizes = [1, 256], strides = [1, 1]} : vector<8x256xf32> to vector<1x256xf32>
    %88 = vector.broadcast %87 : vector<1x256xf32> to vector<24x256xf32>
    %89 = arith.mulf %86, %88 : vector<24x256xf32>
    %90 = arith.addf %81, %89 : vector<24x256xf32>
    %c0_13 = arith.constant 0 : index
    %c0_14 = arith.constant 0 : index
    %91 = vector.load %arg5[%c0_13, %c0_14] : memref<24x1xf32, #tpu.memory_space<vmem>>, vector<24x1xf32>
    %92 = vector.broadcast %91 : vector<24x1xf32> to vector<24x256xf32>
    %93 = arith.addf %90, %92 : vector<24x256xf32>
    %cst_15 = arith.constant 0.000000e+00 : f32
    %94 = vector.broadcast %cst_15 : f32 to vector<24x256xf32>
    %95 = arith.maximumf %93, %94 : vector<24x256xf32>
    %c0_16 = arith.constant 0 : index
    %c0_17 = arith.constant 0 : index
    %96 = vector.load %arg6[%c0_16, %c0_17] : memref<16x24xbf16, #tpu.memory_space<vmem>>, vector<16x24xbf16>
    %97 = arith.truncf %95 : vector<24x256xf32> to vector<24x256xbf16>
    %cst_18 = arith.constant dense<0.000000e+00> : vector<16x256xf32>
    %98 = tpu.matmul %96, %97, %cst_18 {dimension_numbers = #tpu.dot_dimension_numbers<[1], [0], [0], [1], [0, 0, 1, 1], [], []>} : vector<16x24xbf16>, vector<24x256xbf16>, vector<16x256xf32> -> vector<16x256xf32>
    %c0_19 = arith.constant 0 : index
    %c0_20 = arith.constant 0 : index
    %99 = vector.load %arg7[%c0_19, %c0_20] : memref<16x1xf32, #tpu.memory_space<vmem>>, vector<16x1xf32>
    %100 = vector.broadcast %99 : vector<16x1xf32> to vector<16x256xf32>
    %101 = arith.addf %98, %100 : vector<16x256xf32>
    %102 = arith.addf %101, %12 : vector<16x256xf32>
    %c0_21 = arith.constant 0 : index
    %c0_22 = arith.constant 0 : index
    %103 = vector.load %arg10[%c0_21, %c0_22] : memref<16x256xf32, #tpu.memory_space<vmem>>, vector<16x256xf32>
    tpu.vector_store %arg10[%c0_21, %c0_22], %102 {strides = array<i32>} : memref<16x256xf32, #tpu.memory_space<vmem>>, vector<16x256xf32>,
    return
  }
  func.func @transform_0(%arg0: i32) -> (i32, i32) {
    %c0_i32 = arith.constant 0 : i32
    %c0_i32_0 = arith.constant 0 : i32
    return %c0_i32, %arg0 : i32, i32
  }
  func.func @transform_1(%arg0: i32) -> (i32, i32) {
    %c0_i32 = arith.constant 0 : i32
    %c0_i32_0 = arith.constant 0 : i32
    %c0_i32_1 = arith.constant 0 : i32
    return %c0_i32, %c0_i32_0 : i32, i32
  }
  func.func @transform_2(%arg0: i32) -> (i32, i32) {
    %c0_i32 = arith.constant 0 : i32
    %c0_i32_0 = arith.constant 0 : i32
    %c0_i32_1 = arith.constant 0 : i32
    return %c0_i32, %c0_i32_0 : i32, i32
  }
  func.func @transform_3(%arg0: i32) -> (i32, i32, i32) {
    %c0_i32 = arith.constant 0 : i32
    %c0_i32_0 = arith.constant 0 : i32
    %c0_i32_1 = arith.constant 0 : i32
    %c0_i32_2 = arith.constant 0 : i32
    return %c0_i32, %c0_i32_0, %c0_i32_1 : i32, i32, i32
  }
  func.func @transform_4(%arg0: i32) -> (i32, i32) {
    %c0_i32 = arith.constant 0 : i32
    %c0_i32_0 = arith.constant 0 : i32
    %c0_i32_1 = arith.constant 0 : i32
    return %c0_i32, %c0_i32_0 : i32, i32
  }
  func.func @transform_5(%arg0: i32) -> (i32, i32) {
    %c0_i32 = arith.constant 0 : i32
    %c0_i32_0 = arith.constant 0 : i32
    %c0_i32_1 = arith.constant 0 : i32
    return %c0_i32, %c0_i32_0 : i32, i32
  }
  func.func @transform_6(%arg0: i32) -> (i32, i32) {
    %c0_i32 = arith.constant 0 : i32
    %c0_i32_0 = arith.constant 0 : i32
    %c0_i32_1 = arith.constant 0 : i32
    return %c0_i32, %c0_i32_0 : i32, i32
  }
  func.func @transform_7(%arg0: i32) -> (i32, i32) {
    %c0_i32 = arith.constant 0 : i32
    %c0_i32_0 = arith.constant 0 : i32
    %c0_i32_1 = arith.constant 0 : i32
    return %c0_i32, %c0_i32_0 : i32, i32
  }
  func.func @transform_8(%arg0: i32) -> (i32, i32) {
    %c0_i32 = arith.constant 0 : i32
    %c0_i32_0 = arith.constant 0 : i32
    %c0_i32_1 = arith.constant 0 : i32
    return %c0_i32, %c0_i32_0 : i32, i32
  }
  func.func @transform_9(%arg0: i32) -> (i32, i32) {
    %c0_i32 = arith.constant 0 : i32
    %c0_i32_0 = arith.constant 0 : i32
    return %c0_i32, %arg0 : i32, i32
  }
}

</mosaic_0001>

<bundles_post_ra>
// kernel: tpu_custom_call.1
= control target key start
LH: loop header
LB: loop body
LE: loop exit
PB: predicated region body
PF: predicated region fallthrough
CT: control target
= control target key end

     0   :  { %14 = vsyncpa [#allocation3], 0  ;;  %s2176_s0 = inlined_call_operand.vmem [shape: bf16[8,512], index: 0, kind: input, shape index: {}]   ;;  %s2177_s1 = inlined_call_operand.vmem [shape: bf16[40,8], index: 1, kind: input, shape index: {}]   ;;  %s2178_s2 = inlined_call_operand.vmem [shape: f32[24,1], index: 2, kind: input, shape index: {}]   ;;  %s2179_s3 = inlined_call_operand.vmem [shape: f32[9,24,1], index: 3, kind: input, shape index: {}]   ;;  %s2180_s4 = inlined_call_operand.vmem [shape: f32[24,1], index: 4, kind: input, shape index: {}]   ;;  %s2181_s5 = inlined_call_operand.vmem [shape: bf16[16,24], index: 5, kind: input, shape index: {}]   ;;  %s2182_s6 = inlined_call_operand.vmem [shape: f32[16,1], index: 6, kind: input, shape index: {}]   ;;  %s2183_s7 = inlined_call_operand.vmem [shape: f32[16,1], index: 7, kind: input, shape index: {}]   ;;  %s2184_s8 = inlined_call_operand.vmem [shape: f32[8,256], index: 8, kind: input, shape index: {}]   ;;  %s2185_s9 = inlined_call_operand.hbm [shape: f32[16,512], index: 9, kind: output, shape index: {}]  }
   0x1   :  { %16 = vsyncpa [#allocation3 + $0x1], 0  ;;  %s1416_s30 = smov 0   ;;  %s1418_s10 = smov 0  }
   0x2   :  { %s1420_s11 = smov 0   ;;  %s1422_s12 = smov 0  }
   0x3 LB: > { %s1437_s13 = sadd.s32 4294967295, %s1352_s12   ;;  %s1205_s14 = sadd.s32 4294967294, %s1352_s12   ;;  %s1352_s12 = sphi %s1422_s12, %s2238_s12   ;;  %s1348_s11 = sphi %s1420_s11, %s2237_s11   ;;  %s1344_s10 = sphi %s1418_s10, %s2236_s10   ;;  %s1340_s30 = sphi %s1416_s30, %s2235_s30  }
   0x4   : > { %s1441_s15 = sadd.s32 1, %s1352_s12   ;;  %s223_s16 = sadd.s32 1, %s1348_s11 }
   0x5   : > { %s220_s17 = ssub.s32 %s1352_s12, %s1441_s15  ;;  %p233_p0 = scmp.ne.s32.totalorder %s1348_s11, %s1344_s10 }
   0x6   : > { %p221_p1 = scmp.eq.s32.totalorder %s220_s17, 0  ;;  %p234_p2 = scmp.eq.s32.totalorder %s1437_s13, 1 }
   0x7   : > { %p239_p3 = scmp.ne.s32.totalorder %s1344_s10, %s1340_s30  ;;  %p240_p4 = scmp.eq.s32.totalorder %s1205_s14, 1 }
   0x8   : > { %s1452_s18 = scalar_select %p221_p1, %s1348_s11, %s223_s16  }
   0x9   : > { %p1454_p5 = por %p234_p2, %p233_p0  ;;  %p1458_p6 = por %p240_p4, %p239_p3 }
   0xa   : > { %p1208_p7 = scmp.ge.s32.totalorder %s1352_s12, 1  ;;  %p291_p8 = scmp.lt.s32.totalorder %s1352_s12, 3 }
   0xc   : > { %p292_p9 = pnand %p1208_p7, %p291_p8 }
   0xe   : > { %295 = sbr.rel (%p292_p9) target bundleno = 718 (0x2ce), region = 56 }
  0x15   : > { %s1210_s21 = sshll.u32 %s1437_s13, 1  ;;  %v1354_v0 = vmov 0   ;;  %v437_v1 = vld [vmem:[%s2178_s2] sm:$0xff]  ;;  %v438_v2 = vld [vmem:[%s2178_s2 + $0x8] sm:$0xff]  ;;  %v439_v3 = vld [vmem:[%s2178_s2 + $0x10] sm:$0xff]  ;;  %vm369_vm0 = vcmask 1043456  }
  0x16   : > { %p328_p10 = scmp.lt.s32.totalorder %s1210_s21, 3  ;;  %408 = vmatprep.mubr.bf16.mxu0 %v1354_v0  ;;  %1282 = vset.pattern.permute.xlu0 %v1354_v0  ;;  %v484_v5 = vld [vmem:[%s2179_s3 + $0x8] sm:$0xff]  ;;  %v483_v8 = vld [vmem:[%s2179_s3] sm:$0xff]  ;;  %vm359_vm1 = vcmask 64512   ;;  %v486_v12 = vld [vmem:[%s2179_s3 + $0x18] sm:$0xff]  ;;  %s1355_s24 = smov 15  }
  0x17   : > { %442 = vperm.xlu0 %1282, %v437_v1   ;;  %1283 = vset.pattern.permute.xlu1 %v1354_v0  ;;  %v1286_v10 = vld [vmem:[%s2177_s1] sm:$0xff]   ;;  %v490_v13 = vld [vmem:[%s2179_s3 + $0x38] sm:$0xff]  ;;  %v489_v14 = vld [vmem:[%s2179_s3 + $0x30] sm:$0xff]  ;;  %s1356_s25 = smov 17   ;;  %s1358_s27 = smov 16   ;;  %vm1068_vm10 = vcmask 195584  }
  0x18   : > { %s2240_s21 = smov (!%p328_p10, %s1210_s21), 3  ;;  %428 = vmatprep.mubr.bf16.mxu1 %v1354_v0  ;;  %452 = vperm.xlu1 %1283, %v439_v3   ;;  %v487_v11 = vld [vmem:[%s2179_s3 + $0x20] sm:$0xff]  ;;  %v1287_v15 = vld [vmem:[%s2177_s1 + $0x8] sm:$0xff]   ;;  %v485_v17 = vld [vmem:[%s2179_s3 + $0x10] sm:$0xff]  ;;  %s1359_s28 = smov 111  }
  0x19   : > { %s1211_s26 = sshll.u32 %s2240_s21, 2  ;;  %v488_v16 = vld [vmem:[%s2179_s3 + $0x28] sm:$0xff]  ;;  %v493_v18 = vld [vmem:[%s2179_s3 + $0x50] sm:$0xff]  ;;  %v494_v20 = vld [vmem:[%s2179_s3 + $0x58] sm:$0xff]  ;;  %s1360_s29 = smov 1  }
  0x1a   : > { %s331_s16 = scalar_lea.vmem %s2176_s0, %s1211_s26  ;;  %v492_v19 = vld [vmem:[%s2179_s3 + $0x48] sm:$0xff]  ;;  %v491_v21 = vld [vmem:[%s2179_s3 + $0x40] sm:$0xff]  ;;  %v498_v25 = vld [vmem:[%s2179_s3 + $0x78] sm:$0xff]  ;;  %s1357_s26 = smov 113  }
  0x1b   : > { %447 = vperm.xlu0 %1282, %v438_v2   ;;  %v335_v4 = vld [vmem:[%s331_s16] sm:$0xff]  ;;  %v496_v22 = vld [vmem:[%s2179_s3 + $0x68] sm:$0xff]  ;;  %v502_v26 = vld [vmem:[%s2179_s3 + $0x98] sm:$0xff]  ;;  %s1361_s14 = smov 127   ;;  %s1362_s16 = smov 112  }
  0x1c   : > { %v1216_v6 = vcombine.high %v335_v4, %v335_v4  ;;  %v1215_v7 = vcombine.low %v335_v4, %v335_v4  ;;  %535 = vperm.xlu1 %1283, %v483_v8   ;;  %v495_v23 = vld [vmem:[%s2179_s3 + $0x60] sm:$0xff]  ;;  %v501_v27 = vld [vmem:[%s2179_s3 + $0x90] sm:$0xff]  ;;  %v500_v28 = vld [vmem:[%s2179_s3 + $0x88] sm:$0xff]  ;;  %s1363_s21 = smov [#allocation2]  }
  0x1d   : > { %v499_v24 = vld [vmem:[%s2179_s3 + $0x80] sm:$0xff]  ;;  %v497_v29 = vld [vmem:[%s2179_s3 + $0x70] sm:$0xff]  ;;  %v504_v31 = vld [vmem:[%s2179_s3 + $0xa8] sm:$0xff] }
  0x1e   : > { %1217 = vmatprep.subr.msk.bf16.mxu0 %vm369_vm0, %v1216_v6  ;;  %v371_v9 = vsel %vm369_vm0, %v1215_v7, 0  ;;  %1230 = vmatprep.subr.msk.bf16.mxu1 %vm369_vm0, %v1216_v6  ;;  %v505_v30 = vld [vmem:[%s2179_s3 + $0xb0] sm:$0xff]  ;;  %v507_v32 = vld [vmem:[%s2179_s3 + $0xc0] sm:$0xff]  ;;  %v506_v34 = vld [vmem:[%s2179_s3 + $0xb8] sm:$0xff] }
  0x1f   : > { %540 = vperm.xlu0 %1282, %v484_v5   ;;  %377 = vmatpush1.bf16.msra.mxu0 %v371_v9  ;;  %v503_v33 = vld [vmem:[%s2179_s3 + $0xa0] sm:$0xff]  ;;  %v508_v35 = vld [vmem:[%s2179_s3 + $0xc8] sm:$0xff]  ;;  %v509_v37 = vld [vmem:[%s2179_s3 + $0xd0] sm:$0xff] }
  0x20   : > { %1231 = vmatpush1.bf16.msra.mxu1 %v371_v9  ;;  %589 = vperm.xlu1 %1283, %v486_v12   ;;  %v1015_v36 = vld [vmem:[%s2180_s4] sm:$0xff]  ;;  %v1016_v38 = vld [vmem:[%s2180_s4 + $0x8] sm:$0xff]  ;;  %v1288_v39 = vld [vmem:[%s2177_s1 + $0x10] ss:$0 sps:$4 sm:$0xff]  }
  0x22   : > { %1218 = vmatmul.mubr.msk.bf16.vlgmr.msra.gmra.mrb[0].mxu0 %vm359_vm1, %v1286_v10 }
  0x23   : > { %594 = vperm.xlu0 %1282, %v487_v11   ;;  %418 = vmatprep.mubr.bf16.mxu0 %v1354_v0 }
  0x24   : > { %649 = vperm.xlu1 %1283, %v489_v14   ;;  %1220 = vmatmul.mubr.msk.bf16.vlgmr.msra.gmra.mrb[0].mxu1 %vm359_vm1, %v1288_v39 }
  0x25   : > { %1110 = vmatprep.mubr.bf16.mxu1 %v1354_v0 }
  0x27   : > { %654 = vperm.xlu0 %1282, %v490_v13  }
  0x28   : > { %545 = vperm.xlu1 %1283, %v485_v17  }
  0x2a   : > { %1219 = vmatmul.mubr.msk.bf16.gmra.mrb[4].mxu0 %vm359_vm1, %v1287_v15 }
  0x2b   : > { %599 = vperm.xlu0 %1282, %v488_v16  }
  0x2c   : > { %709 = vperm.xlu1 %1283, %v492_v19  }
  0x2f   : > { %714 = vperm.xlu0 %1282, %v493_v18  }
  0x30   : > { %659 = vperm.xlu1 %1283, %v491_v21  }
  0x33   : > { %719 = vperm.xlu0 %1282, %v494_v20  }
  0x34   : > { %750 = vperm.xlu1 %1283, %v495_v23   ;;  %v1017_v23 = vld [vmem:[%s2180_s4 + $0x10] sm:$0xff] }
  0x37   : > { %755 = vperm.xlu0 %1282, %v496_v22   ;;  %v467_v22 = vld [vmem:[%s2183_s7] sm:$0xff] }
  0x38   : > { %796 = vperm.xlu1 %1283, %v498_v25   ;;  %v468_v25 = vld [vmem:[%s2183_s7 + $0x8] sm:$0xff] }
  0x3b   : > { %801 = vperm.xlu0 %1282, %v499_v24   ;;  %v1051_v24 = vld [vmem:[%s2182_s6] sm:$0xff] }
  0x3c   : > { %856 = vperm.xlu1 %1283, %v501_v27  }
  0x3f   : > { %861 = vperm.xlu0 %1282, %v502_v26  }
  0x40   : > { %760 = vperm.xlu1 %1283, %v497_v29   ;;  %v1052_v29 = vld [vmem:[%s2182_s6 + $0x8] sm:$0xff] }
  0x43   : > { %806 = vperm.xlu0 %1282, %v500_v28  }
  0x44   : > { %916 = vperm.xlu1 %1283, %v504_v31  }
  0x47   : > { %921 = vperm.xlu0 %1282, %v505_v30  }
  0x48   : > { %866 = vperm.xlu1 %1283, %v503_v33  }
  0x4b   : > { %976 = vperm.xlu0 %1282, %v507_v32  }
  0x4c   : > { %981 = vperm.xlu1 %1283, %v508_v35  }
  0x4f   : > { %926 = vperm.xlu0 %1282, %v506_v34  }
  0x50   : > { %986 = vperm.xlu1 %1283, %v509_v37  }
  0x53   : > { %1020 = vperm.xlu0 %1282, %v1015_v36  }
  0x54   : > { %1025 = vperm.xlu1 %1283, %v1016_v38  }
  0x96   : > { %v443_v40 = vpop.permute.xlu0 %442 }
  0x97   : > { %v453_v55 = vpop.permute.xlu1 %452 }
  0x9a   : > { %v448_v53 = vpop.permute.xlu0 %447 }
  0x9b   : > { %v1623_v57 = vpop.permute.xlu1 %535 }
  0x9e   : > { %v1629_v58 = vpop.permute.xlu0 %540 }
  0x9f   : > { %v1635_v59 = vpop.permute.xlu1 %589 }
  0xa2   : > { %v1641_v60 = vpop.permute.xlu0 %594 }
  0xa3   : > { %v1643_v62 = vpop.permute.xlu1 %649 }
  0xa6   : > { %v1651_v0 = vpop.permute.xlu0 %654 }
  0xa7   : > { %v1657_v1 = vpop.permute.xlu1 %545 }
  0xa8   : > { %2203 = vst [vmem:[#allocation7_spill] sm:$0xff] %v1657_v1 }
  0xaa   : > { %v1663_v2 = vpop.permute.xlu0 %599 }
  0xab   : > { %2204 = vst [vmem:[#allocation8_spill] sm:$0xff] %v1663_v2  ;;  %v1665_v3 = vpop.permute.xlu1 %709 }
  0xae   : > { %v1671_v4 = vpop.permute.xlu0 %714 }
  0xaf   : > { %v1677_v5 = vpop.permute.xlu1 %659 }
  0xb0   : > { %2205 = vst [vmem:[#allocation9_spill] sm:$0xff] %v1677_v5 }
  0xb2   : > { %v1683_v7 = vpop.permute.xlu0 %719 }
  0xb3   : > { %2206 = vst [vmem:[#allocation10_spill] sm:$0xff] %v1683_v7  ;;  %v1687_v9 = vpop.permute.xlu1 %750 }
  0xb6   : > { %v1693_v11 = vpop.permute.xlu0 %755 }
  0xb7   : > { %v1695_v12 = vpop.permute.xlu1 %796 }
  0xba   : > { %v1707_v14 = vpop.permute.xlu0 %801 }
  0xbb   : > { %v1709_v15 = vpop.permute.xlu1 %856 }
  0xbe   : > { %v1715_v16 = vpop.permute.xlu0 %861 }
  0xbf   : > { %v1717_v17 = vpop.permute.xlu1 %760 }
  0xc0   : > { %2209 = vst [vmem:[#allocation13_spill] sm:$0xff] %v1717_v17 }
  0xc2   : > { %v1727_v18 = vpop.permute.xlu0 %806 }
  0xc3   : > { %2210 = vst [vmem:[#allocation14_spill] sm:$0xff] %v1727_v18  ;;  %v1729_v19 = vpop.permute.xlu1 %916 }
  0xc6   : > { %v1735_v20 = vpop.permute.xlu0 %921 }
  0xc7   : > { %v1737_v21 = vpop.permute.xlu1 %866 }
  0xc8   : > { %2211 = vst [vmem:[#allocation15_spill] sm:$0xff] %v1737_v21 }
  0xca   : > { %v1755_v26 = vpop.permute.xlu0 %976 }
  0xcb   : > { %v1757_v27 = vpop.permute.xlu1 %981 }
  0xcc   : > { %2212 = vst [vmem:[#allocation16_spill] sm:$0xff] %v1757_v27 }
  0xce   : > { %v1766_v33 = vpop.permute.xlu0 %926 }
  0xcf   : > { %2215 = vst [vmem:[#allocation19_spill] sm:$0xff] %v1766_v33  ;;  %v1768_v34 = vpop.permute.xlu1 %986 }
  0xd0   : > { %2216 = vst [vmem:[#allocation20_spill] sm:$0xff] %v1768_v34 }
  0xd2   : > { %v1770_v35 = vpop.permute.xlu0 %1020 }
  0xd3   : > { %v1772_v36 = vpop.permute.xlu1 %1025 }
  0xd4   : > { %2217 = vst [vmem:[#allocation21_spill] sm:$0xff] %v1772_v36 }
  0xf5   : > { %v410_v41 = vpop.f32.mrb[0].mxu0 }
  0xf6   : > { %v455_v42 = vadd.f32 %v443_v40, %v410_v41  ;;  %v412_v43 = vpop.f32.mrb[1].mxu0  ;;  %v524_v41 = vlaneseq }
  0xf7   : > { %v414_v44 = vpop.f32.mrb[2].mxu0  ;;  %v456_v50 = vadd.f32 %v443_v40, %v412_v43  ;;  %v1759_v28 = vpop.f32.mrb[0].mxu1 }
  0xf8   : > { %v1585_v45 = vmax.f32 %v455_v42, 0.0  ;;  %v416_v46 = vpop.f32.mrb[3].mxu0  ;;  %v457_v54 = vadd.f32 %v448_v53, %v414_v44  ;;  %2213 = vst [vmem:[#allocation17_spill] sm:$0xff] %v1759_v28  ;;  %v1764_v30 = vpop.f32.mrb[1].mxu1  ;;  %v1778_v44 = vshrl.u32 %v524_v41, 7 }
  0xf9   : > { %v1603_v52 = vmax.f32 %v456_v50, 0.0  ;;  %v458_v61 = vadd.f32 %v448_v53, %v416_v46  ;;  %2214 = vst [vmem:[#allocation18_spill] sm:$0xff] %v1764_v30  ;;  %v434_v31 = vpop.f32.mrb[2].mxu1  ;;  %v1788_v53 = vld [vmem:[%s2184_s8] sm:$0xff] }
  0xfa   : > { %628 = vrot.lane.b32.xlu0 %v1585_v45, %s1355_s24  ;;  %512 = vrot.lane.b32.xlu1 %v1585_v45, %s1356_s25  ;;  %v1617_v56 = vmax.f32 %v457_v54, 0.0  ;;  %v435_v32 = vpop.f32.mrb[3].mxu1  ;;  %v670_v50 = vsub.s32 2, %v1778_v44  ;;  %v1793_v54 = vld [vmem:[%s2184_s8 + $0x8] sm:$0xff]  ;;  %v610_v31 = vsub.s32 1, %v1778_v44 }
  0xfb   : > { %v1649_v63 = vmax.f32 %v458_v61, 0.0  ;;  %v877_v61 = vsub.s32 5, %v1778_v44 }
  0xfc   : > { %v1848_v33 = vrot.slane %v1788_v53, %v610_v31 }
  0xfd   : > { %v420_v47 = vpop.f32.mrb[4].mxu0  ;;  %v1822_v32 = vrot.slane %v1793_v54, %v877_v61 }
  0xfe   : > { %835 = vrot.lane.b32.xlu0 %v1585_v45, %s1357_s26  ;;  %568 = vrot.lane.b32.xlu1 %v1585_v45, %s1358_s27  ;;  %v422_v48 = vpop.f32.mrb[5].mxu0  ;;  %v459_v6 = vadd.f32 %v453_v55, %v420_v47 }
  0xff   : > { %v1595_v49 = vpop.f32.mrb[6].mxu0  ;;  %v460_v10 = vadd.f32 %v453_v55, %v422_v48  ;;  %v1782_v48 = vand.u32 127, %v524_v41 }
 0x100   : > { %2201 = vst [vmem:[#allocation5_spill] sm:$0xff] %v1595_v49  ;;  %v1597_v51 = vpop.f32.mrb[7].mxu0  ;;  %v1685_v8 = vmax.f32 %v459_v6, 0.0 }
 0x101   : > { %2202 = vst [vmem:[#allocation6_spill] sm:$0xff] %v1597_v51  ;;  %v1701_v13 = vmax.f32 %v460_v10, 0.0  ;;  %v997_v10 = vsub.s32 7, %v1778_v44  ;;  %vm640_vm2 = vcmp.lt.s32.totalorder %v1782_v48, 15  ;;  %vm526_vm3 = vcmp.lt.s32.totalorder %v1782_v48, 17 }
 0x102   : > { %955 = vrot.lane.b32.xlu0 %v1585_v45, %s1359_s28  ;;  %688 = vrot.lane.b32.xlu1 %v1585_v45, %s1360_s29  ;;  %2207 = vst [vmem:[#allocation11_spill] sm:$0xff] %v1685_v8  ;;  %vm847_vm4 = vcmp.lt.s32.totalorder %v1782_v48, 113  ;;  %vm967_vm5 = vcmp.lt.s32.totalorder %v1782_v48, 111  ;;  %vm580_vm6 = vcmp.lt.s32.totalorder %v1782_v48, 16  ;;  %vm700_vm7 = vcmp.lt.s32.totalorder %v1782_v48, 1 }
 0x103   : > { %2208 = vst [vmem:[#allocation12_spill] sm:$0xff] %v1701_v13  ;;  %vm787_vm8 = vcmp.lt.s32.totalorder %v1782_v48, 127  ;;  %vm907_vm9 = vcmp.lt.s32.totalorder %v1782_v48, 112 }
 0x106   : > { %775 = vrot.lane.b32.xlu1 %v1585_v45, %s1361_s14  ;;  %634 = vrot.lane.b32.xlu0 %v1603_v52, %s1355_s24 }
 0x10a   : > { %895 = vrot.lane.b32.xlu1 %v1585_v45, %s1362_s16  ;;  %841 = vrot.lane.b32.xlu0 %v1603_v52, %s1357_s26 }
 0x10e   : > { %961 = vrot.lane.b32.xlu0 %v1603_v52, %s1359_s28  ;;  %518 = vrot.lane.b32.xlu1 %v1603_v52, %s1356_s25 }
 0x112   : > { %574 = vrot.lane.b32.xlu1 %v1603_v52, %s1358_s27  ;;  %514 = vrot.lane.b32.xlu0 %v1617_v56, %s1356_s25 }
 0x116   : > { %694 = vrot.lane.b32.xlu1 %v1603_v52, %s1360_s29  ;;  %570 = vrot.lane.b32.xlu0 %v1617_v56, %s1358_s27 }
 0x11a   : > { %781 = vrot.lane.b32.xlu1 %v1603_v52, %s1361_s14  ;;  %690 = vrot.lane.b32.xlu0 %v1617_v56, %s1360_s29 }
 0x11e   : > { %901 = vrot.lane.b32.xlu1 %v1603_v52, %s1362_s16  ;;  %777 = vrot.lane.b32.xlu0 %v1617_v56, %s1361_s14 }
 0x122   : > { %630 = vrot.lane.b32.xlu1 %v1617_v56, %s1355_s24  ;;  %897 = vrot.lane.b32.xlu0 %v1617_v56, %s1362_s16 }
 0x126   : > { %837 = vrot.lane.b32.xlu1 %v1617_v56, %s1357_s26  ;;  %520 = vrot.lane.b32.xlu0 %v1649_v63, %s1356_s25 }
 0x12a   : > { %957 = vrot.lane.b32.xlu1 %v1617_v56, %s1359_s28  ;;  %576 = vrot.lane.b32.xlu0 %v1649_v63, %s1358_s27 }
 0x12e   : > { %636 = vrot.lane.b32.xlu1 %v1649_v63, %s1355_s24  ;;  %696 = vrot.lane.b32.xlu0 %v1649_v63, %s1360_s29 }
 0x132   : > { %843 = vrot.lane.b32.xlu1 %v1649_v63, %s1357_s26  ;;  %783 = vrot.lane.b32.xlu0 %v1649_v63, %s1361_s14 }
 0x136   : > { %963 = vrot.lane.b32.xlu1 %v1649_v63, %s1359_s28  ;;  %903 = vrot.lane.b32.xlu0 %v1649_v63, %s1362_s16 }
 0x13a   : > { %839 = vrot.lane.b32.xlu0 %v1685_v8, %s1357_s26  ;;  %516 = vrot.lane.b32.xlu1 %v1685_v8, %s1356_s25 }
 0x13e   : > { %899 = vrot.lane.b32.xlu0 %v1685_v8, %s1362_s16  ;;  %572 = vrot.lane.b32.xlu1 %v1685_v8, %s1358_s27 }
 0x142   : > { %632 = vrot.lane.b32.xlu1 %v1685_v8, %s1355_s24  ;;  %522 = vrot.lane.b32.xlu0 %v1701_v13, %s1356_s25  ;;  %s324_s25 = sand.u32 1, %s1344_s10  }
 0x146   : > { %692 = vrot.lane.b32.xlu1 %v1685_v8, %s1360_s29  ;;  %578 = vrot.lane.b32.xlu0 %v1701_v13, %s1358_s27 }
 0x14a   : > { %779 = vrot.lane.b32.xlu1 %v1685_v8, %s1361_s14  ;;  %638 = vrot.lane.b32.xlu0 %v1701_v13, %s1355_s24  ;;  %s1294_s24 = sshll.u32 %s1363_s21, 4  ;;  %s1295_s24 = int_to_ptr.vmem [resolvable:$false] %s1294_s24 }
 0x14e   : > { %845 = vrot.lane.b32.xlu1 %v1701_v13, %s1357_s26  ;;  %698 = vrot.lane.b32.xlu0 %v1701_v13, %s1360_s29  ;;  %s1209_s26 = sshll.u32 %s324_s25, 5 }
 0x14f   : > { %s326_s29 = scalar_lea.vmem [#allocation2], %s1209_s26  ;;  %s1296_s26 = scalar_lea.vmem %s1295_s24, 1024 }
 0x152   : > { %905 = vrot.lane.b32.xlu1 %v1701_v13, %s1362_s16  ;;  %785 = vrot.lane.b32.xlu0 %v1701_v13, %s1361_s14  ;;  %s1229_s14 = sshll.u32 %s1437_s13, 8  ;;  %s2134_s13 = scalar_lea.sflag [#allocation3], %s324_s25 }
 0x153   : > { %s2130_s22 = scalar_lea.hbm %s2185_s9, %s1229_s14 }
 0x156   : > { %965 = vrot.lane.b32.xlu1 %v1701_v13, %s1359_s28  ;;  %959 = vrot.lane.b32.xlu0 %v1685_v8, %s1359_s28  ;;  %s1143_s28 = sshll.u32 %s326_s29, 4  ;;  %s2125_s28 = int_to_ptr.vmem [resolvable:$true] %s1143_s28 }
 0x157   : > { %s1290_s23 = scalar_lea.vmem %s2125_s28, 512  ;;  %p1297_p0 = scmp.lt.s32.totalorder %s2125_s28, %s1295_s24 }
 0x158   : > { %p1291_p11 = scmp.ne.s32.totalorder %s2125_s28, %s1290_s23  ;;  %p1298_p1 = scmp.lt.s32.totalorder %s1296_s26, %s1290_s23 }
 0x15a   : > { %471 = vperm.xlu1 %1283, %v467_v22   ;;  %1030 = vperm.xlu0 %1282, %v1017_v23   ;;  %v1801_v22 = vmul.f32 %v1687_v9, %v1585_v45  ;;  %v556_v23 = vsub.s32 0, %v1778_v44  ;;  %v1819_v45 = vrot.slane %v1788_v53, %v877_v61  ;;  %p1292_p12 = pnand %p1291_p11, %p1454_p5  ;;  %p1299_p2 = por %p1298_p1, %p1297_p0 }
 0x15c   : > { %v1841_v34 = vrot.slane %v1788_v53, %v556_v23  ;;  %p1293_p13 = pneg %p1292_p12 }
 0x15e   : > { %1055 = vperm.xlu1 %1283, %v1051_v24   ;;  %476 = vperm.xlu0 %1282, %v468_v25   ;;  %v1808_v24 = vmul.f32 %v1687_v9, %v1603_v52  ;;  %v1811_v25 = vrot.slane %v1788_v53, %v670_v50  ;;  %v730_v52 = vsub.s32 3, %v1778_v44  ;;  %v1826_v9 = vrot.slane %v1788_v53, %v997_v10  ;;  %p1300_p3 = pnand %p1299_p2, %p1293_p13 }
 0x160   : > { %v1871_v8 = vrot.slane %v1793_v54, %v730_v52 }
 0x162   : > { %1060 = vperm.xlu0 %1282, %v1052_v29   ;;  %v1814_v29 = vrot.slane %v1793_v54, %v670_v50  ;;  %v1829_v50 = vrot.slane %v1793_v54, %v997_v10  ;;  %v1845_v10 = vrot.slane %v1793_v54, %v556_v23  ;;  %v1860_v23 = vrot.slane %v1788_v53, %v730_v52 }
 0x16c   : > { %v629_v37 = vpop.permute.xlu0 %628  ;;  %v513_v38 = vpop.permute.xlu1 %512 }
 0x170   : > { %v836_v39 = vpop.permute.xlu0 %835  ;;  %v569_v40 = vpop.permute.xlu1 %568 }
 0x174   : > { %v1774_v42 = vpop.permute.xlu0 %955  ;;  %v1776_v43 = vpop.permute.xlu1 %688 }
 0x178   : > { %v1780_v46 = vpop.permute.xlu1 %775  ;;  %v635_v47 = vpop.permute.xlu0 %634 }
 0x179   : > { %v641_v61 = vsel %vm640_vm2, %v629_v37, %v635_v47  ;;  %v644_v49 = vsel %vm640_vm2, %v635_v47, %v629_v37 }
 0x17a   : > { %v662_v13 = vmul.f32 %v1643_v62, %v644_v49  ;;  %v663_v17 = vmul.f32 %v1643_v62, %v641_v61 }
 0x17c   : > { %v1795_v55 = vpop.permute.xlu1 %895  ;;  %v842_v6 = vpop.permute.xlu0 %841  ;;  %v676_v5 = vmul.f32 %v1811_v25, %v662_v13 }
 0x17d   : > { %v848_v49 = vsel %vm847_vm4, %v836_v39, %v842_v6  ;;  %v851_v62 = vsel %vm847_vm4, %v842_v6, %v836_v39  ;;  %v677_v39 = vmul.f32 %v1814_v29, %v663_v17  ;;  %v937_v17 = vsub.s32 6, %v1778_v44 }
 0x17e   : > { %v869_v1 = vmul.f32 %v1709_v15, %v848_v49  ;;  %v870_v13 = vmul.f32 %v1709_v15, %v851_v62 }
 0x180   : > { %v962_v41 = vpop.permute.xlu0 %961  ;;  %v519_v30 = vpop.permute.xlu1 %518 }
 0x181   : > { %v527_v28 = vsel %vm526_vm3, %v513_v38, %v519_v30  ;;  %v530_v51 = vsel %vm526_vm3, %v519_v30, %v513_v38  ;;  %v1851_v30 = vrot.slane %v1793_v54, %v610_v31  ;;  %v817_v38 = vsub.s32 4, %v1778_v44 }
 0x182   : > { %v548_v37 = vmul.f32 %v1623_v57, %v530_v51  ;;  %v549_v47 = vmul.f32 %v1623_v57, %v527_v28  ;;  %v971_v15 = vsel %vm967_vm5, %v962_v41, %v1774_v42 }
 0x183   : > { %v1879_v61 = vrot.slane %v1788_v53, %v817_v38 }
 0x184   : > { %v575_v21 = vpop.permute.xlu1 %574  ;;  %v1856_v18 = vpop.permute.xlu0 %514 }
 0x185   : > { %v581_v31 = vsel %vm580_vm6, %v569_v40, %v575_v21  ;;  %v584_v51 = vsel %vm580_vm6, %v575_v21, %v569_v40  ;;  %v1882_v21 = vrot.slane %v1793_v54, %v817_v38  ;;  %v562_v40 = vmul.f32 %v1841_v34, %v548_v37 }
 0x186   : > { %v602_v57 = vmul.f32 %v1635_v59, %v584_v51  ;;  %v603_v28 = vmul.f32 %v1635_v59, %v581_v31  ;;  %v563_v59 = vmul.f32 %v1845_v10, %v549_v47 }
 0x188   : > { %v616_v52 = vmul.f32 %v1848_v33, %v602_v57  ;;  %v617_v31 = vmul.f32 %v1851_v30, %v603_v28  ;;  %v695_v51 = vpop.permute.xlu1 %694  ;;  %v1888_v7 = vpop.permute.xlu0 %570 }
 0x189   : > { %v701_v6 = vsel %vm700_vm7, %v1776_v43, %v695_v51  ;;  %v704_v38 = vsel %vm700_vm7, %v695_v51, %v1776_v43  ;;  %v883_v51 = vmul.f32 %v1819_v45, %v869_v1 }
 0x18a   : > { %v622_v37 = vadd.f32 %v616_v52, %v562_v40  ;;  %v623_v47 = vadd.f32 %v617_v31, %v563_v59  ;;  %v722_v57 = vmul.f32 %v1665_v3, %v704_v38  ;;  %v723_v28 = vmul.f32 %v1665_v3, %v701_v6 }
 0x18b   : > { %v968_v3 = vsel %vm967_vm5, %v1774_v42, %v962_v41  ;;  %v1923_v42 = vrot.slane %v1788_v53, %v937_v17  ;;  %v1926_v41 = vrot.slane %v1793_v54, %v937_v17  ;;  %v990_v38 = vmul.f32 %v1755_v26, %v971_v15 }
 0x18c   : > { %v682_v2 = vadd.f32 %v676_v5, %v622_v37  ;;  %v683_v36 = vadd.f32 %v677_v39, %v623_v47  ;;  %v736_v27 = vmul.f32 %v1860_v23, %v722_v57  ;;  %v737_v43 = vmul.f32 %v1871_v8, %v723_v28  ;;  %v782_v40 = vpop.permute.xlu1 %781  ;;  %v691_v59 = vpop.permute.xlu0 %690 }
 0x18d   : > { %v788_v44 = vsel %vm787_vm8, %v1780_v46, %v782_v40  ;;  %v791_v5 = vsel %vm787_vm8, %v782_v40, %v1780_v46  ;;  %v884_v39 = vmul.f32 %v1822_v32, %v870_v13  ;;  %v989_v1 = vmul.f32 %v1755_v26, %v968_v3 }
 0x18e   : > { %v742_v49 = vadd.f32 %v736_v27, %v682_v2  ;;  %v743_v62 = vadd.f32 %v737_v43, %v683_v36  ;;  %v809_v52 = vmul.f32 %v1695_v12, %v788_v44  ;;  %v810_v31 = vmul.f32 %v1695_v12, %v791_v5 }
 0x18f   : > { %v1003_v40 = vmul.f32 %v1826_v9, %v989_v1  ;;  %v1004_v3 = vmul.f32 %v1829_v50, %v990_v38 }
 0x190   : > { %v769_v6 = vadd.f32 %v1801_v22, %v742_v49  ;;  %v770_v46 = vadd.f32 %v1808_v24, %v743_v62  ;;  %v823_v2 = vmul.f32 %v1879_v61, %v809_v52  ;;  %v824_v27 = vmul.f32 %v1882_v21, %v810_v31  ;;  %v902_v36 = vpop.permute.xlu1 %901  ;;  %v1932_v12 = vpop.permute.xlu0 %777 }
 0x191   : > { %v908_v53 = vsel %vm907_vm9, %v1795_v55, %v902_v36  ;;  %v911_v54 = vsel %vm907_vm9, %v902_v36, %v1795_v55 }
 0x192   : > { %v829_v22 = vadd.f32 %v823_v2, %v769_v6  ;;  %v830_v24 = vadd.f32 %v824_v27, %v770_v46  ;;  %v929_v37 = vmul.f32 %v1729_v19, %v908_v53  ;;  %v930_v47 = vmul.f32 %v1729_v19, %v911_v54 }
 0x194   : > { %v889_v57 = vadd.f32 %v883_v51, %v829_v22  ;;  %v890_v28 = vadd.f32 %v884_v39, %v830_v24  ;;  %v943_v13 = vmul.f32 %v1923_v42, %v929_v37  ;;  %v944_v26 = vmul.f32 %v1926_v41, %v930_v47  ;;  %v631_v17 = vpop.permute.xlu1 %630  ;;  %v1946_v43 = vpop.permute.xlu0 %897 }
 0x196   : > { %v949_v55 = vadd.f32 %v943_v13, %v889_v57  ;;  %v950_v15 = vadd.f32 %v944_v26, %v890_v28 }
 0x198   : > { %v1009_v44 = vadd.f32 %v1003_v40, %v949_v55  ;;  %v838_v5 = vpop.permute.xlu1 %837  ;;  %v521_v49 = vpop.permute.xlu0 %520  ;;  %v1010_v62 = vadd.f32 %v1004_v3, %v950_v15 }
 0x199   : > { %v528_v31 = vsel %vm526_vm3, %v1856_v18, %v521_v49  ;;  %v531_v51 = vsel %vm526_vm3, %v521_v49, %v1856_v18 }
 0x19a   : > { %v1951_v19 = vadd.f32 %v1770_v35, %v1010_v62  ;;  %v1954_v52 = vadd.f32 %v1770_v35, %v1009_v44  ;;  %v550_v35 = vmul.f32 %v1629_v58, %v531_v51  ;;  %v551_v27 = vmul.f32 %v1629_v58, %v528_v31 }
 0x19b   : > { %v765_v31 = vmul.f32 %v1693_v11, %v1617_v56  ;;  %v766_v51 = vmul.f32 %v1693_v11, %v1649_v63 }
 0x19c   : > { %v958_v39 = vpop.permute.xlu1 %957  ;;  %v577_v6 = vpop.permute.xlu0 %576  ;;  %v565_v37 = vmul.f32 %v1845_v10, %v551_v27 }
 0x19d   : > { %v582_v46 = vsel %vm580_vm6, %v1888_v7, %v577_v6  ;;  %v585_v2 = vsel %vm580_vm6, %v577_v6, %v1888_v7 }
 0x19e   : > { %v604_v36 = vmul.f32 %v1641_v60, %v585_v2  ;;  %v605_v1 = vmul.f32 %v1641_v60, %v582_v46  ;;  %v564_v60 = vmul.f32 %v1841_v34, %v550_v35 }
 0x1a0   : > { %v618_v18 = vmul.f32 %v1848_v33, %v604_v36  ;;  %v619_v38 = vmul.f32 %v1851_v30, %v605_v1  ;;  %v637_v53 = vpop.permute.xlu1 %636  ;;  %v697_v54 = vpop.permute.xlu0 %696 }
 0x1a1   : > { %v642_v22 = vsel %vm640_vm2, %v631_v17, %v637_v53  ;;  %v645_v7 = vsel %vm640_vm2, %v637_v53, %v631_v17  ;;  %v702_v24 = vsel %vm700_vm7, %v691_v59, %v697_v54  ;;  %v705_v58 = vsel %vm700_vm7, %v697_v54, %v691_v59 }
 0x1a2   : > { %v664_v47 = vmul.f32 %v1651_v0, %v645_v7  ;;  %v665_v57 = vmul.f32 %v1651_v0, %v642_v22  ;;  %v724_v28 = vmul.f32 %v1671_v4, %v705_v58  ;;  %v725_v13 = vmul.f32 %v1671_v4, %v702_v24 }
 0x1a3   : > { %v624_v26 = vadd.f32 %v618_v18, %v564_v60  ;;  %v625_v17 = vadd.f32 %v619_v38, %v565_v37 }
 0x1a4   : > { %v678_v40 = vmul.f32 %v1811_v25, %v664_v47  ;;  %v679_v3 = vmul.f32 %v1814_v29, %v665_v57  ;;  %v844_v55 = vpop.permute.xlu1 %843  ;;  %v784_v59 = vpop.permute.xlu0 %783  ;;  %v738_v62 = vmul.f32 %v1860_v23, %v724_v28  ;;  %v739_v4 = vmul.f32 %v1871_v8, %v725_v13  ;;  %v2218_v57 = vld [vmem:[#allocation16_spill] sm:$0xff] }
 0x1a5   : > { %v849_v15 = vsel %vm847_vm4, %v838_v5, %v844_v55  ;;  %v852_v44 = vsel %vm847_vm4, %v844_v55, %v838_v5  ;;  %v789_v6 = vsel %vm787_vm8, %v1932_v12, %v784_v59  ;;  %v792_v5 = vsel %vm787_vm8, %v784_v59, %v1932_v12 }
 0x1a6   : > { %v684_v49 = vadd.f32 %v678_v40, %v624_v26  ;;  %v685_v0 = vadd.f32 %v679_v3, %v625_v17  ;;  %v871_v35 = vmul.f32 %v1715_v16, %v849_v15  ;;  %v872_v27 = vmul.f32 %v1715_v16, %v852_v44 }
 0x1a7   : > { %v811_v56 = vmul.f32 %v1707_v14, %v789_v6  ;;  %v812_v63 = vmul.f32 %v1707_v14, %v792_v5  ;;  %v1040_v5 = vmax.f32 %v1951_v19, 0.0 }
 0x1a8   : > { %v744_v46 = vadd.f32 %v738_v62, %v684_v49  ;;  %v745_v2 = vadd.f32 %v739_v4, %v685_v0  ;;  %v964_v36 = vpop.permute.xlu1 %963  ;;  %v904_v1 = vpop.permute.xlu0 %903  ;;  %v885_v22 = vmul.f32 %v1819_v45, %v871_v35  ;;  %v886_v7 = vmul.f32 %v1822_v32, %v872_v27 }
 0x1a9   : > { %v969_v38 = vsel %vm967_vm5, %v958_v39, %v964_v36  ;;  %v972_v12 = vsel %vm967_vm5, %v964_v36, %v958_v39  ;;  %v825_v53 = vmul.f32 %v1879_v61, %v811_v56  ;;  %v826_v54 = vmul.f32 %v1882_v21, %v812_v63 }
 0x1aa   : > { %v771_v11 = vadd.f32 %v765_v31, %v744_v46  ;;  %v772_v18 = vadd.f32 %v766_v51, %v745_v2  ;;  %v909_v16 = vsel %vm907_vm9, %v1946_v43, %v904_v1  ;;  %v912_v14 = vsel %vm907_vm9, %v904_v1, %v1946_v43  ;;  %v2219_v31 = vld [vmem:[#allocation21_spill] sm:$0xff] }
 0x1ab   : > { %v931_v24 = vmul.f32 %v1735_v20, %v909_v16  ;;  %v932_v39 = vmul.f32 %v1735_v20, %v912_v14  ;;  %v991_v28 = vmul.f32 %v2218_v57, %v969_v38  ;;  %v992_v13 = vmul.f32 %v2218_v57, %v972_v12  ;;  %v2220_v38 = vld [vmem:[#allocation8_spill] sm:$0xff] }
 0x1ac   : > { %v2026_v58 = vpop.permute.xlu0 %839  ;;  %v517_v60 = vpop.permute.xlu1 %516  ;;  %v831_v37 = vadd.f32 %v825_v53, %v771_v11  ;;  %v832_v47 = vadd.f32 %v826_v54, %v772_v18  ;;  %v1039_v2 = vmax.f32 %v1954_v52, 0.0  ;;  %v2221_v53 = vld [vmem:[#allocation7_spill] sm:$0xff] }
 0x1ad   : > { %v945_v43 = vmul.f32 %v1923_v42, %v931_v24  ;;  %v946_v40 = vmul.f32 %v1926_v41, %v932_v39  ;;  %v1005_v20 = vmul.f32 %v1826_v9, %v991_v28  ;;  %v1006_v59 = vmul.f32 %v1829_v50, %v992_v13  ;;  %v2222_v39 = vld [vmem:[#allocation9_spill] sm:$0xff] }
 0x1ae   : > { %v891_v26 = vadd.f32 %v885_v22, %v831_v37  ;;  %v892_v17 = vadd.f32 %v886_v7, %v832_v47 }
 0x1b0   : > { %v2032_v3 = vpop.permute.xlu0 %899  ;;  %v573_v55 = vpop.permute.xlu1 %572  ;;  %v951_v15 = vadd.f32 %v945_v43, %v891_v26  ;;  %v952_v44 = vadd.f32 %v946_v40, %v892_v17 }
 0x1b2   : > { %v1011_v49 = vadd.f32 %v1005_v20, %v951_v15  ;;  %v1012_v0 = vadd.f32 %v1006_v59, %v952_v44  ;;  %v2223_v15 = vld [vmem:[#allocation10_spill] sm:$0xff]  ;;  %v2224_v44 = vld [vmem:[#allocation11_spill] sm:$0xff] }
 0x1b4   : > { %v633_v62 = vpop.permute.xlu1 %632  ;;  %v523_v4 = vpop.permute.xlu0 %522  ;;  %v1036_v51 = vadd.f32 %v2219_v31, %v1012_v0  ;;  %v1035_v6 = vadd.f32 %v2219_v31, %v1011_v49 }
 0x1b5   : > { %v529_v27 = vsel %vm526_vm3, %v517_v60, %v523_v4  ;;  %v532_v36 = vsel %vm526_vm3, %v523_v4, %v517_v60 }
 0x1b6   : > { %v1042_v46 = vmax.f32 %v1036_v51, 0.0  ;;  %v1041_v35 = vmax.f32 %v1035_v6, 0.0  ;;  %v552_v54 = vmul.f32 %v2221_v53, %v532_v36  ;;  %v553_v16 = vmul.f32 %v2221_v53, %v529_v27 }
 0x1b8   : > { %v693_v1 = vpop.permute.xlu1 %692  ;;  %v579_v56 = vpop.permute.xlu0 %578  ;;  %v1048_v18 = vpack.c.bf16 %v1042_v46, %v1040_v5  ;;  %v1047_v19 = vpack.c.bf16 %v1041_v35, %v1039_v2  ;;  %v566_v28 = vmul.f32 %v1841_v34, %v552_v54  ;;  %v567_v13 = vmul.f32 %v1845_v10, %v553_v16  ;;  %v2225_v10 = vld [vmem:[#allocation13_spill] sm:$0xff] }
 0x1b9   : > { %v583_v63 = vsel %vm580_vm6, %v573_v55, %v579_v56  ;;  %v586_v11 = vsel %vm580_vm6, %v579_v56, %v573_v55  ;;  %v767_v49 = vmul.f32 %v2225_v10, %v2224_v44 }
 0x1ba   : > { %v606_v12 = vmul.f32 %v2220_v38, %v586_v11  ;;  %v607_v52 = vmul.f32 %v2220_v38, %v583_v63  ;;  %1078 = vmatprep.subr.bf16.mxu1 %v1048_v18 }
 0x1bb   : > { %1079 = vmatpush1.bf16.msra.mxu1 %v1047_v19 }
 0x1bc   : > { %v780_v14 = vpop.permute.xlu1 %779  ;;  %v639_v22 = vpop.permute.xlu0 %638  ;;  %v620_v47 = vmul.f32 %v1848_v33, %v606_v12  ;;  %v621_v57 = vmul.f32 %v1851_v30, %v607_v52 }
 0x1bd   : > { %v643_v7 = vsel %vm640_vm2, %v633_v62, %v639_v22  ;;  %v646_v24 = vsel %vm640_vm2, %v639_v22, %v633_v62  ;;  %v2226_v62 = vld [vmem:[#allocation12_spill] sm:$0xff]  ;;  %v2229_v22 = vld [vmem:[#allocation19_spill] sm:$0xff] }
 0x1be   : > { %v666_v60 = vmul.f32 %v2222_v39, %v646_v24  ;;  %v667_v37 = vmul.f32 %v2222_v39, %v643_v7  ;;  %v626_v59 = vadd.f32 %v620_v47, %v566_v28  ;;  %v627_v33 = vadd.f32 %v621_v57, %v567_v13  ;;  %v2230_v28 = vld [vmem:[#allocation20_spill] sm:$0xff] }
 0x1c0   : > { %v846_v26 = vpop.permute.xlu1 %845  ;;  %v699_v17 = vpop.permute.xlu0 %698  ;;  %v680_v43 = vmul.f32 %v1811_v25, %v666_v60  ;;  %v681_v40 = vmul.f32 %v1814_v29, %v667_v37  ;;  %v768_v25 = vmul.f32 %v2225_v10, %v2226_v62 }
 0x1c1   : > { %v703_v55 = vsel %vm700_vm7, %v693_v1, %v699_v17  ;;  %v706_v20 = vsel %vm700_vm7, %v699_v17, %v693_v1  ;;  %v850_v6 = vsel %vm847_vm4, %v2026_v58, %v846_v26  ;;  %v853_v5 = vsel %vm847_vm4, %v846_v26, %v2026_v58  ;;  %v2228_v58 = vld [vmem:[#allocation15_spill] sm:$0xff] }
 0x1c2   : > { %v726_v30 = vmul.f32 %v2223_v15, %v706_v20  ;;  %v727_v34 = vmul.f32 %v2223_v15, %v703_v55  ;;  %v686_v29 = vadd.f32 %v680_v43, %v626_v59  ;;  %v687_v4 = vadd.f32 %v681_v40, %v627_v33 }
 0x1c3   : > { %v873_v19 = vmul.f32 %v2228_v58, %v850_v6  ;;  %v874_v38 = vmul.f32 %v2228_v58, %v853_v5  ;;  %v2233_v5 = vld [vmem:[#allocation17_spill] sm:$0xff] }
 0x1c4   : > { %v786_v0 = vpop.permute.xlu0 %785  ;;  %v740_v31 = vmul.f32 %v1860_v23, %v726_v30  ;;  %v741_v51 = vmul.f32 %v1871_v8, %v727_v34  ;;  %v906_v46 = vpop.permute.xlu1 %905  ;;  %v2227_v23 = vld [vmem:[#allocation14_spill] sm:$0xff] }
 0x1c5   : > { %v790_v2 = vsel %vm787_vm8, %v780_v14, %v786_v0  ;;  %v793_v35 = vsel %vm787_vm8, %v786_v0, %v780_v14  ;;  %v910_v12 = vsel %vm907_vm9, %v2032_v3, %v906_v46  ;;  %v913_v52 = vsel %vm907_vm9, %v906_v46, %v2032_v3 }
 0x1c6   : > { %v746_v27 = vadd.f32 %v740_v31, %v686_v29  ;;  %v747_v36 = vadd.f32 %v741_v51, %v687_v4  ;;  %v813_v1 = vmul.f32 %v2227_v23, %v790_v2  ;;  %v814_v8 = vmul.f32 %v2227_v23, %v793_v35  ;;  %v2232_v29 = vld [vmem:[#allocation6_spill] sm:$0xff] }
 0x1c7   : > { %v933_v7 = vmul.f32 %v2229_v22, %v910_v12  ;;  %v934_v24 = vmul.f32 %v2229_v22, %v913_v52 }
 0x1c8   : > { %v773_v56 = vadd.f32 %v767_v49, %v746_v27  ;;  %v774_v63 = vadd.f32 %v768_v25, %v747_v36  ;;  %v827_v11 = vmul.f32 %v1879_v61, %v813_v1  ;;  %v828_v18 = vmul.f32 %v1882_v21, %v814_v8  ;;  %v966_v16 = vpop.permute.xlu1 %965  ;;  %v960_v14 = vpop.permute.xlu0 %959  ;;  %v2231_v49 = vld [vmem:[#allocation5_spill] sm:$0xff]  ;;  %v2234_v36 = vld [vmem:[#allocation18_spill] sm:$0xff] }
 0x1c9   : > { %v887_v61 = vmul.f32 %v1819_v45, %v873_v19  ;;  %v888_v21 = vmul.f32 %v1822_v32, %v874_v38  ;;  %v970_v39 = vsel %vm967_vm5, %v960_v14, %v966_v16  ;;  %v973_v60 = vsel %vm967_vm5, %v966_v16, %v960_v14 }
 0x1ca   : > { %v833_v53 = vadd.f32 %v827_v11, %v773_v56  ;;  %v834_v54 = vadd.f32 %v828_v18, %v774_v63  ;;  %v947_v47 = vmul.f32 %v1923_v42, %v933_v7  ;;  %v948_v57 = vmul.f32 %v1926_v41, %v934_v24 }
 0x1cb   : > { %v993_v45 = vmul.f32 %v2230_v28, %v970_v39  ;;  %v994_v32 = vmul.f32 %v2230_v28, %v973_v60 }
 0x1cc   : > { %v893_v37 = vadd.f32 %v887_v61, %v833_v53  ;;  %v894_v3 = vadd.f32 %v888_v21, %v834_v54 }
 0x1cd   : > { %v1007_v17 = vmul.f32 %v1826_v9, %v993_v45  ;;  %v1008_v43 = vmul.f32 %v1829_v50, %v994_v32  ;;  %v1289_v9 = vld [vmem:[%s2181_s5] sm:$0xff]  }
 0x1ce   : > { %v953_v13 = vadd.f32 %v947_v47, %v893_v37  ;;  %v954_v26 = vadd.f32 %v948_v57, %v894_v3 }
 0x1d0   : > { %v1013_v40 = vadd.f32 %v1007_v17, %v953_v13  ;;  %v1014_v48 = vadd.f32 %v1008_v43, %v954_v26 }
 0x1d9   : > { %v1031_v55 = vpop.permute.xlu0 %1030  ;;  %v472_v50 = vpop.permute.xlu1 %471 }
 0x1da   : > { %v1037_v20 = vadd.f32 %v1031_v55, %v1013_v40  ;;  %v1038_v59 = vadd.f32 %v1031_v55, %v1014_v48  ;;  %v479_v0 = vadd.f32 %v472_v50, %v2231_v49  ;;  %v480_v4 = vadd.f32 %v472_v50, %v2232_v29 }
 0x1dc   : > { %v1043_v42 = vmax.f32 %v1037_v20, 0.0  ;;  %v1044_v33 = vmax.f32 %v1038_v59, 0.0 }
 0x1dd   : > { %v477_v34 = vpop.permute.xlu0 %476  ;;  %v1056_v44 = vpop.permute.xlu1 %1055 }
 0x1de   : > { %v1049_v41 = vpack.c.bf16 %v1043_v42, %v1043_v42  ;;  %v1050_v15 = vpack.c.bf16 %v1044_v33, %v1044_v33  ;;  %v481_v46 = vadd.f32 %v477_v34, %v2233_v5  ;;  %v482_v23 = vadd.f32 %v477_v34, %v2234_v36 }
 0x1e0   : > { %1222 = vmatprep.subr.msk.bf16.mxu1 %vm369_vm0, %v1050_v15  ;;  %v1073_v30 = vsel %vm369_vm0, %v1049_v41, 0 }
 0x1e1   : > { %1081 = vmatpush1.bf16.msra.mxu1 %v1073_v30  ;;  %v1061_v31 = vpop.permute.xlu0 %1060 }
 0x1e4   : > { %1223 = vmatmul.mubr.msk.bf16.vlgmr.msra.gmra.mrb[4].mxu1 %vm1068_vm10, %v1289_v9 }
 0x2b7   : > { %v1112_v10 = vpop.f32.mrb[4].mxu1 }
 0x2b8   : > { %v1113_v62 = vadd.f32 %v1112_v10, %v1056_v44  ;;  %v1114_v25 = vpop.f32.mrb[5].mxu1 }
 0x2b9   : > { %v1115_v51 = vadd.f32 %v1114_v25, %v1056_v44  ;;  %v1116_v6 = vpop.f32.mrb[6].mxu1 }
 0x2ba   : > { %v1121_v2 = vadd.f32 %v1113_v62, %v479_v0  ;;  %v1117_v35 = vadd.f32 %v1116_v6, %v1061_v31  ;;  %v1118_v27 = vpop.f32.mrb[7].mxu1 }
 0x2bb   : > { %v1122_v1 = vadd.f32 %v1115_v51, %v480_v4  ;;  %v1119_v8 = vadd.f32 %v1118_v27, %v1061_v31 }
 0x2bc   : > { %1125 = vst [vmem:[%s326_s29] sm:$0xff] %v1121_v2  ;;  %v1123_v56 = vadd.f32 %v1117_v35, %v481_v46 }
 0x2bd   : > { %1126 = vst [vmem:[%s326_s29 + $0x8] sm:$0xff] %v1122_v1  ;;  %v1124_v63 = vadd.f32 %v1119_v8, %v482_v23 }
 0x2be   : > { %1127 = vst [vmem:[%s326_s29 + $0x10] sm:$0xff] %v1123_v56 }
 0x2bf   : > { %1128 = vst [vmem:[%s326_s29 + $0x18] sm:$0xff] %v1124_v63 }
 0x2c0   : > { %1303 = shalt.err (!%p1300_p3)
}
 0x2c1   : > { %s1304_s25 = scalar_lea.hbm %s2130_s22, 512  ;;  %s1308_s16 = scalar_lea.hbm %s2185_s9, 1024 }
 0x2c2   : > { %p1305_p4 = scmp.ne.s32.totalorder %s2130_s22, %s1304_s25  ;;  %p1309_p9 = scmp.lt.u32.totalorder %s2130_s22, %s2185_s9 }
 0x2c3   : > { %p1310_p10 = scmp.lt.u32.totalorder %s1308_s16, %s1304_s25  ;;  %p1312_p12 = scmp.lt.u32.totalorder %s1304_s25, %s2130_s22 }
 0x2c4   : > { %p1306_p7 = pnand %p1305_p4, %p1454_p5 }
 0x2c5   : > { %p1311_p11 = por %p1310_p10, %p1309_p9 }
 0x2c6   : > { %p1307_p8 = pneg %p1306_p7 }
 0x2c7   : > { %p1313_p13 = por %p1312_p12, %p1311_p11 }
 0x2c9   : > { %p1314_p0 = pnand %p1313_p13, %p1307_p8 }
 0x2cb   : > { %1317 = shalt.err (!%p1314_p0)
}
 0x2cc   : > { %s1364_s23 = smov 256   ;;  %s1365_s24 = smov 512  }
 0x2cd   : > { %1232 = dma.vmem_to_hbm [thread:$0]  (%p1454_p5), %s2125_s28, 512, %s2130_s22, %s2134_s13, %s1364_s23, %s1365_s24, %s1358_s27  }
 0x2ce PF: > { %p1238_p1 = scmp.ge.s32.totalorder %s1352_s12, 2  ;;  %s1158_s26 = sand.u32 1, %s1340_s30  }
 0x2cf   : > { %s1159_s25 = scalar_lea.sflag [#allocation3], %s1158_s26 }
 0x2d0   : > { %p1235_p2 = pnand %p1238_p1, %p1458_p6 }
 0x2d2   : > { %1335 = dma.done.wait (!%p1235_p2), %s1159_s25, 512  }
 0x2d3   : > { %1337 = vsyncadd (!%p1235_p2), %s1159_s25, 4294966784  ;;  %p19_p3 = scmp.ge.s32.totalorder %s1441_s15, 4   ;;  %s2235_s30 = smov %s1344_s10 }
 0x2d4   : > { %s2236_s10 = smov %s1348_s11  ;;  %s2237_s11 = smov %s1452_s18 }
 0x2d5   : > { %s2238_s12 = smov %s1441_s15  ;;  %21 = sbr.rel (!%p19_p3) target bundleno = 3 (0x3), region = 91 }
 0x2dc   :  { %1164 = vsyncpa [#allocation3], 1 }
 0x2dd   :  { %1166 = vsyncpa [#allocation3 + $0x1], 1 }

</bundles_post_ra>
